<compile_context>
chip_gen: v5e
topology: v5e:2x2
jax: 0.10.0
libtpu: 0.0.40
codegen_flags: <defaults>
</compile_context>

<pallas_src>
import functools

import jax
import jax.numpy as jnp
from jax import lax
from jax.experimental import pallas as pl
from jax.experimental.pallas import tpu as pltpu

MATMUL_DTYPE = jnp.bfloat16        # MXU input/GEMM-output dtype (f32 accumulate)
_LANE = 128                        # channel axis padded to this (lane-dense)


def _round_up(x, m):
    return (x + m - 1) // m * m


@functools.lru_cache(maxsize=1)
def _vmem_sizes():
    """(working-set budget, scoped vmem_limit_bytes) per TPU generation."""
    phys = 64 * 1024 * 1024                      # conservative default (v7x)
    try:
        phys = int(pltpu.get_tpu_info().vmem_capacity_bytes)
    except Exception:
        pass
    if phys >= 128 * 1024 * 1024:                # v5e / v6e: 128 MiB physical
        return 64 * 1024 * 1024, 100 * 1024 * 1024
    return 28 * 1024 * 1024, 48 * 1024 * 1024    # v7x: 64 MiB physical


def _cparams():
    _, limit = _vmem_sizes()
    return pltpu.CompilerParams(
        dimension_semantics=("parallel",),
        vmem_limit_bytes=limit,
    )


def _choose_gemm_tile(M, per_row_bytes, resident_bytes):
    """Row tile for the GEMM kernels.

    Returns (tm, M_pad): tm is a multiple of 8 dividing M_pad, prefers an
    exact divisor of M (no padding) and a grid of >= 2 steps (both v7x
    TensorCores busy), and never exceeds the per-generation VMEM budget.
    """
    budget, _ = _vmem_sizes()
    avail = max(budget - resident_bytes, 8 * per_row_bytes)
    cap = int(avail // max(per_row_bytes, 1))
    cap = min(1024, cap)
    if M >= 16:                                  # keep >= 2 grid steps
        cap = min(cap, _round_up(M, 16) // 2)
    cap = max(8, cap - cap % 8)
    if M % 8 == 0:
        for t in range(cap, 7, -8):
            if M % t == 0:
                return t, M
    return cap, _round_up(M, cap)                # pad rows instead of one giant block


def _choose_elem_tile(M_pad, per_row_bytes):
    """Row tile for the memory-bound elementwise passes (decoupled from the
    GEMM tile; long lane-dense DMAs, still >= 2 grid steps)."""
    budget, _ = _vmem_sizes()
    cap = int(budget // max(per_row_bytes, 1))
    cap = min(1024, cap, M_pad)
    if M_pad >= 16:
        cap = min(cap, M_pad // 2)
    cap = max(8, cap - cap % 8)
    for t in range(cap, 7, -8):
        if M_pad % t == 0:
            return t
    return 8


# ----------------------------------------------------------------------------
# Pallas kernels
# ----------------------------------------------------------------------------
def _gemm_stats_kernel(x_ref, w_ref, y_ref, psum_ref, psq_ref):
    # (tm, K)bf16 @ (K, Cw)bf16 -> f32 accumulate; stored as bf16 (halves the
    # GEMM's HBM store traffic).  Training-mode BN partial channel sums /
    # sums-of-squares are taken from the f32 accumulator before the cast and
    # kept as 8 sublane rows (VPU-only adds); the tiny (G, 8, Cw) reduction
    # happens in JAX afterwards.
    acc = jnp.dot(x_ref[...], w_ref[...], preferred_element_type=jnp.float32)
    y_ref[...] = acc.astype(y_ref.dtype)
    tm, c = acc.shape
    g = acc.reshape(tm // 8, 8, c)
    psum_ref[...] = jnp.sum(g, axis=0)[None]
    psq_ref[...] = jnp.sum(g * g, axis=0)[None]


def _bn_relu_kernel(y_ref, s_ref, t_ref, o_ref):
    # o = relu(y*scale + shift); f32 elementwise math (v5e-safe), bf16 store.
    y = y_ref[...].astype(jnp.float32)
    o_ref[...] = jnp.maximum(y * s_ref[...] + t_ref[...], 0.0).astype(o_ref.dtype)


def _bn_add_relu_kernel(y_ref, s_ref, t_ref, r_ref, rs_ref, rt_ref, o_ref):
    # o = relu((y*s + t) + (r*rs + rt)); the shortcut's BN rides in the same
    # memory-bound pass so the shortcut activation never makes its own trip.
    main = y_ref[...].astype(jnp.float32) * s_ref[...] + t_ref[...]
    resid = r_ref[...].astype(jnp.float32) * rs_ref[...] + rt_ref[...]
    o_ref[...] = jnp.maximum(main + resid, 0.0).astype(o_ref.dtype)


# ----------------------------------------------------------------------------
# pallas_call wrappers
# ----------------------------------------------------------------------------
def conv_gemm_bn_stats(patches, wmat, tm):
    """Fused conv-as-GEMM (bf16 in / bf16 out) with BN partial-stats epilogue."""
    M_pad, K = patches.shape
    Cw = wmat.shape[1]
    G = M_pad // tm
    y, psum, psq = pl.pallas_call(
        _gemm_stats_kernel,
        out_shape=(
            jax.ShapeDtypeStruct((M_pad, Cw), MATMUL_DTYPE),
            jax.ShapeDtypeStruct((G, 8, Cw), jnp.float32),
            jax.ShapeDtypeStruct((G, 8, Cw), jnp.float32),
        ),
        grid=(G,),
        in_specs=[
            pl.BlockSpec((tm, K), lambda i: (i, 0)),
            # TODO(synk): pipeline_mode=pl.Buffered(1) on this constant-index
            # weight tile would reclaim K*Cw*2 bytes of VMEM (matters on v7x).
            pl.BlockSpec((K, Cw), lambda i: (0, 0)),
        ],
        out_specs=(
            pl.BlockSpec((tm, Cw), lambda i: (i, 0)),
            pl.BlockSpec((1, 8, Cw), lambda i: (i, 0, 0)),
            pl.BlockSpec((1, 8, Cw), lambda i: (i, 0, 0)),
        ),
        compiler_params=_cparams(),
    )(patches, wmat)
    return y, jnp.sum(psum, axis=(0, 1)), jnp.sum(psq, axis=(0, 1))


def bn_relu_apply(y, scale, shift, tm, col_block, out_dtype):
    """relu(y[:, col_block*Cp:(col_block+1)*Cp] * scale + shift)."""
    M_pad = y.shape[0]
    Cp = scale.shape[1]
    return pl.pallas_call(
        _bn_relu_kernel,
        out_shape=jax.ShapeDtypeStruct((M_pad, Cp), out_dtype),
        grid=(M_pad // tm,),
        in_specs=[
            pl.BlockSpec((tm, Cp), lambda i: (i, col_block)),
            pl.BlockSpec((1, Cp), lambda i: (0, 0)),
            pl.BlockSpec((1, Cp), lambda i: (0, 0)),
        ],
        out_specs=pl.BlockSpec((tm, Cp), lambda i: (i, 0)),
        compiler_params=_cparams(),
    )(y, scale, shift)


def bn_add_relu_apply(y, scale, shift, resid, r_scale, r_shift, tm,
                      resid_col_block, out_dtype):
    M_pad = y.shape[0]
    Cp = scale.shape[1]
    return pl.pallas_call(
        _bn_add_relu_kernel,
        out_shape=jax.ShapeDtypeStruct((M_pad, Cp), out_dtype),
        grid=(M_pad // tm,),
        in_specs=[
            pl.BlockSpec((tm, Cp), lambda i: (i, 0)),
            pl.BlockSpec((1, Cp), lambda i: (0, 0)),
            pl.BlockSpec((1, Cp), lambda i: (0, 0)),
            pl.BlockSpec((tm, Cp), lambda i: (i, resid_col_block)),
            pl.BlockSpec((1, Cp), lambda i: (0, 0)),
            pl.BlockSpec((1, Cp), lambda i: (0, 0)),
        ],
        out_specs=pl.BlockSpec((tm, Cp), lambda i: (i, 0)),
        compiler_params=_cparams(),
    )(y, scale, shift, resid, r_scale, r_shift)


# ----------------------------------------------------------------------------
# Glue (im2col, weight/param packing, BN finalization)
# ----------------------------------------------------------------------------
def im2col(x_nhwc, ksize, stride, pad):
    # TODO(synk): move to an in-kernel halo-DMA formulation to avoid the
    # ksize^2 activation inflation in HBM (kept in bf16 here to halve it).
    N, H, W, C = x_nhwc.shape
    Ho = (H + 2 * pad - ksize) // stride + 1
    Wo = (W + 2 * pad - ksize) // stride + 1
    xp = jnp.pad(x_nhwc, ((0, 0), (pad, pad), (pad, pad), (0, 0)))
    cols = []
    for dy in range(ksize):
        for dx in range(ksize):
            cols.append(xp[:, dy:dy + stride * Ho:stride,
                           dx:dx + stride * Wo:stride, :])
    patches = jnp.concatenate(cols, axis=-1)      # feature order: (ky, kx, c_in)
    return patches.reshape(N * Ho * Wo, ksize * ksize * C), (N, Ho, Wo)


def _w_to_mat(w, cout_pad):
    # (C_out, C_in, kh, kw) -> (kh*kw*C_in, C_out_pad) bf16 in im2col order.
    co, ci, kh, kw = w.shape
    wm = jnp.transpose(w, (2, 3, 1, 0))           # (kh, kw, ci, co)
    wm = jnp.pad(wm, ((0, 0), (0, 0), (0, 0), (0, cout_pad - co)))
    return wm.reshape(kh * kw * ci, cout_pad).astype(MATMUL_DTYPE)


def _shortcut_center_mat(ws, cout_pad):
    # 1x1 projection weights placed at the centre tap of a 3x3 patch matrix so
    # the shortcut GEMM shares conv1's im2col patches (the centre tap of a 3x3
    # stride-s pad-1 patch is exactly the 1x1 stride-s conv's input).
    co, ci = ws.shape[0], ws.shape[1]
    wm = jnp.pad(jnp.transpose(ws[:, :, 0, 0], (1, 0)),
                 ((0, 0), (0, cout_pad - co)))
    full = jnp.zeros((3, 3, ci, cout_pad), wm.dtype).at[1, 1].set(wm)
    return full.reshape(9 * ci, cout_pad).astype(MATMUL_DTYPE)


def _pad_vec(v, cpad):
    return jnp.pad(v.astype(jnp.float32), (0, cpad - v.shape[0]))


def _pad_rows(a, m_pad):
    if a.shape[0] == m_pad:
        return a
    return jnp.pad(a, ((0, m_pad - a.shape[0]), (0, 0)))


def bn_scale_shift(sums, sqs, m_rows, gamma_p, beta_p, eps=1e-5):
    # Training-mode BN from the fused partial sums.  Clamp the single-pass
    # variance at zero (E[x^2]-E[x]^2 can go slightly negative in f32).
    mean = sums / m_rows
    var = jnp.maximum(sqs / m_rows - mean * mean, 0.0)
    scale = gamma_p * lax.rsqrt(var + eps)
    shift = beta_p - mean * scale
    c = scale.shape[0]
    return scale.reshape(1, c), shift.reshape(1, c)


# ----------------------------------------------------------------------------
# ResidualBlock forward
# ----------------------------------------------------------------------------
def residual_block_forward(x_nchw, params, *, stride):
    x = jnp.transpose(x_nchw, (0, 2, 3, 1)).astype(jnp.float32)   # -> NHWC
    N, H, W, Cin = x.shape
    Cout = params["w1"].shape[0]
    Cp = _round_up(Cout, _LANE)                   # lane-dense channel axis
    projection = (stride != 1) or (Cin != Cout)

    # conv1 patches (their centre tap doubles as the 1x1 shortcut's input)
    p1, (n, ho, wo) = im2col(x.astype(MATMUL_DTYPE), 3, stride, 1)
    M, K1 = p1.shape
    K2 = 9 * Cout                                 # conv2 contraction, unpadded

    # weights: conv1 (+ fused 1x1 projection as extra output columns)
    w1m = _w_to_mat(params["w1"], Cp)
    if projection:
        # NOTE: the projection conv bias is exactly cancelled by the
        # training-mode BN mean subtraction, so it is dropped entirely.
        wmat1 = jnp.concatenate(
            [w1m, _shortcut_center_mat(params["ws"], Cp)], axis=1)
    else:
        wmat1 = w1m
    Cw1 = wmat1.shape[1]

    # One GEMM row tile for conv1 and conv2 (keeps the padded row count shared).
    itm = jnp.dtype(MATMUL_DTYPE).itemsize
    per_row = 2 * (max(K1, K2) * itm + max(Cw1, Cp) * itm) + max(Cw1, Cp) * 4
    resident = 2 * max(K1 * Cw1, K2 * Cp) * itm   # double-buffered weight tile
    tm, M_pad = _choose_gemm_tile(M, per_row, resident)
    p1 = _pad_rows(p1, M_pad)

    # conv1 (3x3, stride, pad=1) [+ fused 1x1 shortcut] with BN stats epilogue
    y1cat, s_cat, q_cat = conv_gemm_bn_stats(p1, wmat1, tm)
    sc1, sh1 = bn_scale_shift(s_cat[:Cp], q_cat[:Cp], M,
                              _pad_vec(params["bn1_g"], Cp),
                              _pad_vec(params["bn1_b"], Cp))

    # bn1-apply + relu (bf16 output feeds conv2); own, larger row tile
    tm_e = _choose_elem_tile(M_pad, 24 * Cp)
    a1 = bn_relu_apply(y1cat, sc1, sh1, tm_e, 0, MATMUL_DTYPE)

    # conv2 (3x3, stride=1, pad=1): unpadded-channel patches (K2 = 9*Cout)
    a1_img = a1[:M].reshape(n, ho, wo, Cp)[..., :Cout]
    p2, _ = im2col(a1_img, 3, 1, 1)
    p2 = _pad_rows(p2, M_pad)
    w2m = _w_to_mat(params["w2"], Cp)
    y2, s2, q2 = conv_gemm_bn_stats(p2, w2m, tm)
    sc2, sh2 = bn_scale_shift(s2, q2, M,
                              _pad_vec(params["bn2_g"], Cp),
                              _pad_vec(params["bn2_b"], Cp))

    # shortcut branch
    if projection:
        resid, resid_col = y1cat, 1               # columns [Cp:2Cp] of y1cat
        scs, shs = bn_scale_shift(s_cat[Cp:], q_cat[Cp:], M,
                                  _pad_vec(params["bns_g"], Cp),
                                  _pad_vec(params["bns_b"], Cp))
    else:
        resid = _pad_rows(
            jnp.pad(x.reshape(M, Cin), ((0, 0), (0, Cp - Cin))), M_pad)
        resid_col = 0
        scs = jnp.ones((1, Cp), jnp.float32)
        shs = jnp.zeros((1, Cp), jnp.float32)

    # bn2-apply + shortcut-BN-apply + residual add + relu, one fused pass
    out = bn_add_relu_apply(y2, sc2, sh2, resid, scs, shs, tm_e, resid_col,
                            jnp.float32)
    out = out[:M].reshape(n, ho, wo, Cp)[..., :Cout]
    return jnp.transpose(out, (0, 3, 1, 2))       # -> NCHW


# ----------------------------------------------------------------------------
# Pure-JAX f32 reference (PyTorch semantics; for correctness check only)
# ----------------------------------------------------------------------------
def reference_forward(x, params, stride, eps=1e-5):
    def conv(x, w, s, pad, b=None):
        y = lax.conv_general_dilated(
            x, w, (s, s), [(pad, pad), (pad, pad)],
            dimension_numbers=("NCHW", "OIHW", "NCHW"))
        if b is not None:
            y = y + b[None, :, None, None]
        return y

    def bn(x, g, b):
        mean = jnp.mean(x, axis=(0, 2, 3), keepdims=True)
        var = jnp.mean((x - mean) ** 2, axis=(0, 2, 3), keepdims=True)
        return (x - mean) * lax.rsqrt(var + eps) * g[None, :, None, None] \
            + b[None, :, None, None]

    Cout, Cin = params["w1"].shape[0], params["w1"].shape[1]
    y = jax.nn.relu(bn(conv(x, params["w1"], stride, 1),
                       params["bn1_g"], params["bn1_b"]))
    y = bn(conv(y, params["w2"], 1, 1), params["bn2_g"], params["bn2_b"])
    if stride != 1 or Cin != Cout:
        sc = bn(conv(x, params["ws"], stride, 0, params["ws_b"]),
                params["bns_g"], params["bns_b"])
    else:
        sc = x
    return jax.nn.relu(y + sc)


# ----------------------------------------------------------------------------
if __name__ == "__main__":
    def make_params(key, cin, cout, projection):
        ks = jax.random.split(key, 10)
        p = {
            "w1": 0.1 * jax.random.normal(ks[0], (cout, cin, 3, 3), jnp.float32),
            "bn1_g": 1.0 + 0.1 * jax.random.normal(ks[1], (cout,), jnp.float32),
            "bn1_b": 0.1 * jax.random.normal(ks[2], (cout,), jnp.float32),
            "w2": 0.1 * jax.random.normal(ks[3], (cout, cout, 3, 3), jnp.float32),
            "bn2_g": 1.0 + 0.1 * jax.random.normal(ks[4], (cout,), jnp.float32),
            "bn2_b": 0.1 * jax.random.normal(ks[5], (cout,), jnp.float32),
        }
        if projection:
            p["ws"] = 0.1 * jax.random.normal(ks[6], (cout, cin, 1, 1), jnp.float32)
            p["ws_b"] = 0.1 * jax.random.normal(ks[7], (cout,), jnp.float32)
            p["bns_g"] = 1.0 + 0.1 * jax.random.normal(ks[8], (cout,), jnp.float32)
            p["bns_b"] = 0.1 * jax.random.normal(ks[9], (cout,), jnp.float32)
        return p

    def check(out, ref, name):
        err = float(jnp.max(jnp.abs(out - ref)))
        # bf16 MXU inputs/GEMM outputs vs. an f32 reference -> bf16 tolerance.
        if not jnp.allclose(out, ref, atol=5e-2, rtol=5e-2):
            raise AssertionError(f"{name}: mismatch vs reference, max abs err = {err}")

    key = jax.random.PRNGKey(0)
    k_p1, k_x1, k_p2, k_x2 = jax.random.split(key, 4)

    # Case 1: projection shortcut (stride=2, 4 -> 8 channels), x: (2, 4, 16, 16)
    params1 = make_params(k_p1, 4, 8, projection=True)
    x1 = jax.random.normal(k_x1, (2, 4, 16, 16), jnp.float32)
    fwd1 = jax.jit(functools.partial(residual_block_forward, stride=2))
    out1 = jax.block_until_ready(fwd1(x1, params1))
    assert out1.shape == (2, 8, 8, 8), out1.shape
    check(out1, reference_forward(x1, params1, 2), "projection case")

    # Case 2: identity shortcut (stride=1, 8 -> 8 channels), x: (2, 8, 16, 16)
    params2 = make_params(k_p2, 8, 8, projection=False)
    x2 = jax.random.normal(k_x2, (2, 8, 16, 16), jnp.float32)
    fwd2 = jax.jit(functools.partial(residual_block_forward, stride=1))
    out2 = jax.block_until_ready(fwd2(x2, params2))
    assert out2.shape == (2, 8, 16, 16), out2.shape
    check(out2, reference_forward(x2, params2, 1), "identity case")

    print("KERNEL_OK")
</pallas_src>

<mosaic_0001>
module attributes {stable_mosaic.version = 11 : i64} {
  func.func @_gemm_stats_kernel(%arg0: i32, %arg1: memref<64x36xbf16, #tpu.memory_space<vmem>>, %arg2: memref<36x256xbf16, #tpu.memory_space<vmem>>, %arg3: memref<64x256xbf16, #tpu.memory_space<vmem>>, %arg4: memref<1x8x256xf32, #tpu.memory_space<vmem>>, %arg5: memref<1x8x256xf32, #tpu.memory_space<vmem>>) attributes {dimension_semantics = [#tpu.dimension_semantics<parallel>], iteration_bounds = array<i64: 2>, scalar_prefetch = 0 : i64, scratch_operands = 0 : i64, tpu.core_type = #tpu.core_type<tc>, window_params = [{transform_indices = @transform_0, window_bounds = array<i64: 64, 36>}, {pipeline_mode = #tpu.pipeline_mode<synchronous>, transform_indices = @transform_1, window_bounds = array<i64: 36, 256>}, {transform_indices = @transform_2, window_bounds = array<i64: 64, 256>}, {transform_indices = @transform_3, window_bounds = array<i64: 1, 8, 256>}, {transform_indices = @transform_4, window_bounds = array<i64: 1, 8, 256>}]} {
    %c0 = arith.constant 0 : index
    %c0_0 = arith.constant 0 : index
    %0 = vector.load %arg1[%c0, %c0_0] : memref<64x36xbf16, #tpu.memory_space<vmem>>, vector<64x36xbf16>
    %c0_1 = arith.constant 0 : index
    %c0_2 = arith.constant 0 : index
    %1 = vector.load %arg2[%c0_1, %c0_2] : memref<36x256xbf16, #tpu.memory_space<vmem>>, vector<36x256xbf16>
    %cst = arith.constant dense<0.000000e+00> : vector<64x256xf32>
    %2 = tpu.matmul %0, %1, %cst {dimension_numbers = #tpu.dot_dimension_numbers<[1], [0], [0], [1], [0, 0, 1, 1], [], []>} : vector<64x36xbf16>, vector<36x256xbf16>, vector<64x256xf32> -> vector<64x256xf32>
    %3 = arith.truncf %2 : vector<64x256xf32> to vector<64x256xbf16>
    %c0_3 = arith.constant 0 : index
    %c0_4 = arith.constant 0 : index
    %4 = vector.load %arg3[%c0_3, %c0_4] : memref<64x256xbf16, #tpu.memory_space<vmem>>, vector<64x256xbf16>
    tpu.vector_store %arg3[%c0_3, %c0_4], %3 {strides = array<i32>} : memref<64x256xbf16, #tpu.memory_space<vmem>>, vector<64x256xbf16>,
    %5 = vector.shape_cast %2 : vector<64x256xf32> to vector<8x8x256xf32>
    %cst_5 = arith.constant dense<0.000000e+00> : vector<8x256xf32>
    %6 = vector.multi_reduction <add>, %5, %cst_5 [0] : vector<8x8x256xf32> to vector<8x256xf32>
    %7 = vector.shape_cast %6 : vector<8x256xf32> to vector<1x8x256xf32>
    %c0_6 = arith.constant 0 : index
    %c0_7 = arith.constant 0 : index
    %c0_8 = arith.constant 0 : index
    %8 = vector.load %arg4[%c0_6, %c0_7, %c0_8] : memref<1x8x256xf32, #tpu.memory_space<vmem>>, vector<1x8x256xf32>
    tpu.vector_store %arg4[%c0_6, %c0_7, %c0_8], %7 {strides = array<i32>} : memref<1x8x256xf32, #tpu.memory_space<vmem>>, vector<1x8x256xf32>,
    %9 = arith.mulf %5, %5 : vector<8x8x256xf32>
    %cst_9 = arith.constant dense<0.000000e+00> : vector<8x256xf32>
    %10 = vector.multi_reduction <add>, %9, %cst_9 [0] : vector<8x8x256xf32> to vector<8x256xf32>
    %11 = vector.shape_cast %10 : vector<8x256xf32> to vector<1x8x256xf32>
    %c0_10 = arith.constant 0 : index
    %c0_11 = arith.constant 0 : index
    %c0_12 = arith.constant 0 : index
    %12 = vector.load %arg5[%c0_10, %c0_11, %c0_12] : memref<1x8x256xf32, #tpu.memory_space<vmem>>, vector<1x8x256xf32>
    tpu.vector_store %arg5[%c0_10, %c0_11, %c0_12], %11 {strides = array<i32>} : memref<1x8x256xf32, #tpu.memory_space<vmem>>, vector<1x8x256xf32>,
    return
  }
  func.func @transform_0(%arg0: i32) -> (i32, i32) {
    %c0_i32 = arith.constant 0 : i32
    %c0_i32_0 = arith.constant 0 : i32
    return %arg0, %c0_i32 : i32, i32
  }
  func.func @transform_1(%arg0: i32) -> (i32, i32) {
    %c0_i32 = arith.constant 0 : i32
    %c0_i32_0 = arith.constant 0 : i32
    %c0_i32_1 = arith.constant 0 : i32
    return %c0_i32, %c0_i32_0 : i32, i32
  }
  func.func @transform_2(%arg0: i32) -> (i32, i32) {
    %c0_i32 = arith.constant 0 : i32
    %c0_i32_0 = arith.constant 0 : i32
    return %arg0, %c0_i32 : i32, i32
  }
  func.func @transform_3(%arg0: i32) -> (i32, i32, i32) {
    %c0_i32 = arith.constant 0 : i32
    %c0_i32_0 = arith.constant 0 : i32
    %c0_i32_1 = arith.constant 0 : i32
    return %arg0, %c0_i32, %c0_i32_0 : i32, i32, i32
  }
  func.func @transform_4(%arg0: i32) -> (i32, i32, i32) {
    %c0_i32 = arith.constant 0 : i32
    %c0_i32_0 = arith.constant 0 : i32
    %c0_i32_1 = arith.constant 0 : i32
    return %arg0, %c0_i32, %c0_i32_0 : i32, i32, i32
  }
}

module attributes {stable_mosaic.version = 11 : i64} {
  func.func @_bn_relu_kernel(%arg0: i32, %arg1: memref<64x128xbf16, #tpu.memory_space<vmem>>, %arg2: memref<1x128xf32, #tpu.memory_space<vmem>>, %arg3: memref<1x128xf32, #tpu.memory_space<vmem>>, %arg4: memref<64x128xbf16, #tpu.memory_space<vmem>>) attributes {dimension_semantics = [#tpu.dimension_semantics<parallel>], iteration_bounds = array<i64: 2>, scalar_prefetch = 0 : i64, scratch_operands = 0 : i64, tpu.core_type = #tpu.core_type<tc>, window_params = [{transform_indices = @transform_0, window_bounds = array<i64: 64, 128>}, {pipeline_mode = #tpu.pipeline_mode<synchronous>, transform_indices = @transform_1, window_bounds = array<i64: 1, 128>}, {pipeline_mode = #tpu.pipeline_mode<synchronous>, transform_indices = @transform_2, window_bounds = array<i64: 1, 128>}, {transform_indices = @transform_3, window_bounds = array<i64: 64, 128>}]} {
    %c0 = arith.constant 0 : index
    %c0_0 = arith.constant 0 : index
    %0 = vector.load %arg1[%c0, %c0_0] : memref<64x128xbf16, #tpu.memory_space<vmem>>, vector<64x128xbf16>
    %1 = arith.extf %0 : vector<64x128xbf16> to vector<64x128xf32>
    %c0_1 = arith.constant 0 : index
    %c0_2 = arith.constant 0 : index
    %2 = vector.load %arg2[%c0_1, %c0_2] : memref<1x128xf32, #tpu.memory_space<vmem>>, vector<1x128xf32>
    %3 = vector.broadcast %2 : vector<1x128xf32> to vector<64x128xf32>
    %4 = arith.mulf %1, %3 : vector<64x128xf32>
    %c0_3 = arith.constant 0 : index
    %c0_4 = arith.constant 0 : index
    %5 = vector.load %arg3[%c0_3, %c0_4] : memref<1x128xf32, #tpu.memory_space<vmem>>, vector<1x128xf32>
    %6 = vector.broadcast %5 : vector<1x128xf32> to vector<64x128xf32>
    %7 = arith.addf %4, %6 : vector<64x128xf32>
    %cst = arith.constant 0.000000e+00 : f32
    %8 = vector.broadcast %cst : f32 to vector<64x128xf32>
    %9 = arith.maximumf %7, %8 : vector<64x128xf32>
    %10 = arith.truncf %9 : vector<64x128xf32> to vector<64x128xbf16>
    %c0_5 = arith.constant 0 : index
    %c0_6 = arith.constant 0 : index
    %11 = vector.load %arg4[%c0_5, %c0_6] : memref<64x128xbf16, #tpu.memory_space<vmem>>, vector<64x128xbf16>
    tpu.vector_store %arg4[%c0_5, %c0_6], %10 {strides = array<i32>} : memref<64x128xbf16, #tpu.memory_space<vmem>>, vector<64x128xbf16>,
    return
  }
  func.func @transform_0(%arg0: i32) -> (i32, i32) {
    %c0_i32 = arith.constant 0 : i32
    %c0_i32_0 = arith.constant 0 : i32
    return %arg0, %c0_i32 : i32, i32
  }
  func.func @transform_1(%arg0: i32) -> (i32, i32) {
    %c0_i32 = arith.constant 0 : i32
    %c0_i32_0 = arith.constant 0 : i32
    %c0_i32_1 = arith.constant 0 : i32
    return %c0_i32, %c0_i32_0 : i32, i32
  }
  func.func @transform_2(%arg0: i32) -> (i32, i32) {
    %c0_i32 = arith.constant 0 : i32
    %c0_i32_0 = arith.constant 0 : i32
    %c0_i32_1 = arith.constant 0 : i32
    return %c0_i32, %c0_i32_0 : i32, i32
  }
  func.func @transform_3(%arg0: i32) -> (i32, i32) {
    %c0_i32 = arith.constant 0 : i32
    %c0_i32_0 = arith.constant 0 : i32
    return %arg0, %c0_i32 : i32, i32
  }
}

module attributes {stable_mosaic.version = 11 : i64} {
  func.func @_gemm_stats_kernel(%arg0: i32, %arg1: memref<64x72xbf16, #tpu.memory_space<vmem>>, %arg2: memref<72x128xbf16, #tpu.memory_space<vmem>>, %arg3: memref<64x128xbf16, #tpu.memory_space<vmem>>, %arg4: memref<1x8x128xf32, #tpu.memory_space<vmem>>, %arg5: memref<1x8x128xf32, #tpu.memory_space<vmem>>) attributes {dimension_semantics = [#tpu.dimension_semantics<parallel>], iteration_bounds = array<i64: 2>, scalar_prefetch = 0 : i64, scratch_operands = 0 : i64, tpu.core_type = #tpu.core_type<tc>, window_params = [{transform_indices = @transform_0, window_bounds = array<i64: 64, 72>}, {pipeline_mode = #tpu.pipeline_mode<synchronous>, transform_indices = @transform_1, window_bounds = array<i64: 72, 128>}, {transform_indices = @transform_2, window_bounds = array<i64: 64, 128>}, {transform_indices = @transform_3, window_bounds = array<i64: 1, 8, 128>}, {transform_indices = @transform_4, window_bounds = array<i64: 1, 8, 128>}]} {
    %c0 = arith.constant 0 : index
    %c0_0 = arith.constant 0 : index
    %0 = vector.load %arg1[%c0, %c0_0] : memref<64x72xbf16, #tpu.memory_space<vmem>>, vector<64x72xbf16>
    %c0_1 = arith.constant 0 : index
    %c0_2 = arith.constant 0 : index
    %1 = vector.load %arg2[%c0_1, %c0_2] : memref<72x128xbf16, #tpu.memory_space<vmem>>, vector<72x128xbf16>
    %cst = arith.constant dense<0.000000e+00> : vector<64x128xf32>
    %2 = tpu.matmul %0, %1, %cst {dimension_numbers = #tpu.dot_dimension_numbers<[1], [0], [0], [1], [0, 0, 1, 1], [], []>} : vector<64x72xbf16>, vector<72x128xbf16>, vector<64x128xf32> -> vector<64x128xf32>
    %3 = arith.truncf %2 : vector<64x128xf32> to vector<64x128xbf16>
    %c0_3 = arith.constant 0 : index
    %c0_4 = arith.constant 0 : index
    %4 = vector.load %arg3[%c0_3, %c0_4] : memref<64x128xbf16, #tpu.memory_space<vmem>>, vector<64x128xbf16>
    tpu.vector_store %arg3[%c0_3, %c0_4], %3 {strides = array<i32>} : memref<64x128xbf16, #tpu.memory_space<vmem>>, vector<64x128xbf16>,
    %5 = vector.shape_cast %2 : vector<64x128xf32> to vector<8x8x128xf32>
    %cst_5 = arith.constant dense<0.000000e+00> : vector<8x128xf32>
    %6 = vector.multi_reduction <add>, %5, %cst_5 [0] : vector<8x8x128xf32> to vector<8x128xf32>
    %7 = vector.shape_cast %6 : vector<8x128xf32> to vector<1x8x128xf32>
    %c0_6 = arith.constant 0 : index
    %c0_7 = arith.constant 0 : index
    %c0_8 = arith.constant 0 : index
    %8 = vector.load %arg4[%c0_6, %c0_7, %c0_8] : memref<1x8x128xf32, #tpu.memory_space<vmem>>, vector<1x8x128xf32>
    tpu.vector_store %arg4[%c0_6, %c0_7, %c0_8], %7 {strides = array<i32>} : memref<1x8x128xf32, #tpu.memory_space<vmem>>, vector<1x8x128xf32>,
    %9 = arith.mulf %5, %5 : vector<8x8x128xf32>
    %cst_9 = arith.constant dense<0.000000e+00> : vector<8x128xf32>
    %10 = vector.multi_reduction <add>, %9, %cst_9 [0] : vector<8x8x128xf32> to vector<8x128xf32>
    %11 = vector.shape_cast %10 : vector<8x128xf32> to vector<1x8x128xf32>
    %c0_10 = arith.constant 0 : index
    %c0_11 = arith.constant 0 : index
    %c0_12 = arith.constant 0 : index
    %12 = vector.load %arg5[%c0_10, %c0_11, %c0_12] : memref<1x8x128xf32, #tpu.memory_space<vmem>>, vector<1x8x128xf32>
    tpu.vector_store %arg5[%c0_10, %c0_11, %c0_12], %11 {strides = array<i32>} : memref<1x8x128xf32, #tpu.memory_space<vmem>>, vector<1x8x128xf32>,
    return
  }
  func.func @transform_0(%arg0: i32) -> (i32, i32) {
    %c0_i32 = arith.constant 0 : i32
    %c0_i32_0 = arith.constant 0 : i32
    return %arg0, %c0_i32 : i32, i32
  }
  func.func @transform_1(%arg0: i32) -> (i32, i32) {
    %c0_i32 = arith.constant 0 : i32
    %c0_i32_0 = arith.constant 0 : i32
    %c0_i32_1 = arith.constant 0 : i32
    return %c0_i32, %c0_i32_0 : i32, i32
  }
  func.func @transform_2(%arg0: i32) -> (i32, i32) {
    %c0_i32 = arith.constant 0 : i32
    %c0_i32_0 = arith.constant 0 : i32
    return %arg0, %c0_i32 : i32, i32
  }
  func.func @transform_3(%arg0: i32) -> (i32, i32, i32) {
    %c0_i32 = arith.constant 0 : i32
    %c0_i32_0 = arith.constant 0 : i32
    %c0_i32_1 = arith.constant 0 : i32
    return %arg0, %c0_i32, %c0_i32_0 : i32, i32, i32
  }
  func.func @transform_4(%arg0: i32) -> (i32, i32, i32) {
    %c0_i32 = arith.constant 0 : i32
    %c0_i32_0 = arith.constant 0 : i32
    %c0_i32_1 = arith.constant 0 : i32
    return %arg0, %c0_i32, %c0_i32_0 : i32, i32, i32
  }
}

module attributes {stable_mosaic.version = 11 : i64} {
  func.func @_bn_add_relu_kernel(%arg0: i32, %arg1: memref<64x128xbf16, #tpu.memory_space<vmem>>, %arg2: memref<1x128xf32, #tpu.memory_space<vmem>>, %arg3: memref<1x128xf32, #tpu.memory_space<vmem>>, %arg4: memref<64x128xbf16, #tpu.memory_space<vmem>>, %arg5: memref<1x128xf32, #tpu.memory_space<vmem>>, %arg6: memref<1x128xf32, #tpu.memory_space<vmem>>, %arg7: memref<64x128xf32, #tpu.memory_space<vmem>>) attributes {dimension_semantics = [#tpu.dimension_semantics<parallel>], iteration_bounds = array<i64: 2>, scalar_prefetch = 0 : i64, scratch_operands = 0 : i64, tpu.core_type = #tpu.core_type<tc>, window_params = [{transform_indices = @transform_0, window_bounds = array<i64: 64, 128>}, {pipeline_mode = #tpu.pipeline_mode<synchronous>, transform_indices = @transform_1, window_bounds = array<i64: 1, 128>}, {pipeline_mode = #tpu.pipeline_mode<synchronous>, transform_indices = @transform_2, window_bounds = array<i64: 1, 128>}, {transform_indices = @transform_3, window_bounds = array<i64: 64, 128>}, {pipeline_mode = #tpu.pipeline_mode<synchronous>, transform_indices = @transform_4, window_bounds = array<i64: 1, 128>}, {pipeline_mode = #tpu.pipeline_mode<synchronous>, transform_indices = @transform_5, window_bounds = array<i64: 1, 128>}, {transform_indices = @transform_6, window_bounds = array<i64: 64, 128>}]} {
    %c0 = arith.constant 0 : index
    %c0_0 = arith.constant 0 : index
    %0 = vector.load %arg1[%c0, %c0_0] : memref<64x128xbf16, #tpu.memory_space<vmem>>, vector<64x128xbf16>
    %1 = arith.extf %0 : vector<64x128xbf16> to vector<64x128xf32>
    %c0_1 = arith.constant 0 : index
    %c0_2 = arith.constant 0 : index
    %2 = vector.load %arg2[%c0_1, %c0_2] : memref<1x128xf32, #tpu.memory_space<vmem>>, vector<1x128xf32>
    %3 = vector.broadcast %2 : vector<1x128xf32> to vector<64x128xf32>
    %4 = arith.mulf %1, %3 : vector<64x128xf32>
    %c0_3 = arith.constant 0 : index
    %c0_4 = arith.constant 0 : index
    %5 = vector.load %arg3[%c0_3, %c0_4] : memref<1x128xf32, #tpu.memory_space<vmem>>, vector<1x128xf32>
    %6 = vector.broadcast %5 : vector<1x128xf32> to vector<64x128xf32>
    %7 = arith.addf %4, %6 : vector<64x128xf32>
    %c0_5 = arith.constant 0 : index
    %c0_6 = arith.constant 0 : index
    %8 = vector.load %arg4[%c0_5, %c0_6] : memref<64x128xbf16, #tpu.memory_space<vmem>>, vector<64x128xbf16>
    %9 = arith.extf %8 : vector<64x128xbf16> to vector<64x128xf32>
    %c0_7 = arith.constant 0 : index
    %c0_8 = arith.constant 0 : index
    %10 = vector.load %arg5[%c0_7, %c0_8] : memref<1x128xf32, #tpu.memory_space<vmem>>, vector<1x128xf32>
    %11 = vector.broadcast %10 : vector<1x128xf32> to vector<64x128xf32>
    %12 = arith.mulf %9, %11 : vector<64x128xf32>
    %c0_9 = arith.constant 0 : index
    %c0_10 = arith.constant 0 : index
    %13 = vector.load %arg6[%c0_9, %c0_10] : memref<1x128xf32, #tpu.memory_space<vmem>>, vector<1x128xf32>
    %14 = vector.broadcast %13 : vector<1x128xf32> to vector<64x128xf32>
    %15 = arith.addf %12, %14 : vector<64x128xf32>
    %16 = arith.addf %7, %15 : vector<64x128xf32>
    %cst = arith.constant 0.000000e+00 : f32
    %17 = vector.broadcast %cst : f32 to vector<64x128xf32>
    %18 = arith.maximumf %16, %17 : vector<64x128xf32>
    %c0_11 = arith.constant 0 : index
    %c0_12 = arith.constant 0 : index
    %19 = vector.load %arg7[%c0_11, %c0_12] : memref<64x128xf32, #tpu.memory_space<vmem>>, vector<64x128xf32>
    tpu.vector_store %arg7[%c0_11, %c0_12], %18 {strides = array<i32>} : memref<64x128xf32, #tpu.memory_space<vmem>>, vector<64x128xf32>,
    return
  }
  func.func @transform_0(%arg0: i32) -> (i32, i32) {
    %c0_i32 = arith.constant 0 : i32
    %c0_i32_0 = arith.constant 0 : i32
    return %arg0, %c0_i32 : i32, i32
  }
  func.func @transform_1(%arg0: i32) -> (i32, i32) {
    %c0_i32 = arith.constant 0 : i32
    %c0_i32_0 = arith.constant 0 : i32
    %c0_i32_1 = arith.constant 0 : i32
    return %c0_i32, %c0_i32_0 : i32, i32
  }
  func.func @transform_2(%arg0: i32) -> (i32, i32) {
    %c0_i32 = arith.constant 0 : i32
    %c0_i32_0 = arith.constant 0 : i32
    %c0_i32_1 = arith.constant 0 : i32
    return %c0_i32, %c0_i32_0 : i32, i32
  }
  func.func @transform_3(%arg0: i32) -> (i32, i32) {
    %c1_i32 = arith.constant 1 : i32
    %c0_i32 = arith.constant 0 : i32
    return %arg0, %c1_i32 : i32, i32
  }
  func.func @transform_4(%arg0: i32) -> (i32, i32) {
    %c0_i32 = arith.constant 0 : i32
    %c0_i32_0 = arith.constant 0 : i32
    %c0_i32_1 = arith.constant 0 : i32
    return %c0_i32, %c0_i32_0 : i32, i32
  }
  func.func @transform_5(%arg0: i32) -> (i32, i32) {
    %c0_i32 = arith.constant 0 : i32
    %c0_i32_0 = arith.constant 0 : i32
    %c0_i32_1 = arith.constant 0 : i32
    return %c0_i32, %c0_i32_0 : i32, i32
  }
  func.func @transform_6(%arg0: i32) -> (i32, i32) {
    %c0_i32 = arith.constant 0 : i32
    %c0_i32_0 = arith.constant 0 : i32
    return %arg0, %c0_i32 : i32, i32
  }
}

</mosaic_0001>

<bundles_post_ra>
// kernel: residual_block_forward.4
= control target key start
LH: loop header
LB: loop body
LE: loop exit
PB: predicated region body
PF: predicated region fallthrough
CT: control target
= control target key end

     0   :  { %s667_s15 = smov 0   ;;  %s741_s0 = inlined_call_operand.vmem [shape: bf16[128,36], index: 0, kind: input, shape index: {}]   ;;  %s742_s1 = inlined_call_operand.vmem [shape: bf16[36,256], index: 1, kind: input, shape index: {}]   ;;  %s743_s2 = inlined_call_operand.vmem [shape: bf16[128,256], index: 2, kind: output, shape index: {0}]   ;;  %s744_s3 = inlined_call_operand.vmem [shape: f32[2,8,256], index: 3, kind: output, shape index: {1}]   ;;  %s745_s4 = inlined_call_operand.vmem [shape: f32[2,8,256], index: 4, kind: output, shape index: {2}]  }
   0x1 LB: > { %s673_s16 = sadd.s32 4294967295, %s640_s15   ;;  %p557_p0 = scmp.ge.s32.totalorder %s640_s15, 1  ;;  %s640_s15 = sphi %s667_s15, %s15_s15  }
   0x2   : > { %p168_p1 = scmp.lt.s32.totalorder %s640_s15, 3 }
   0x4   : > { %p169_p2 = pnand %p557_p0, %p168_p1 }
   0x5   : > { %s558_s19 = sshll.u32 (!%p169_p2), %s673_s16, 3  ;;  %p218_p4 = scmp.lt.s32.totalorder (!%p169_p2), %s673_s16, 1 }
   0x6   : > { %172 = sbr.rel (%p169_p2) target bundleno = 192 (0xc0), region = 28  ;;  %p206_p3 = scmp.lt.s32.totalorder (!%p169_p2), %s558_s19, 15 }
   0xb   : > { %v241_v0 = vld [vmem:[%s742_s1 + $0x20] sm:$0x33]  ;;  %vm300_vm0 = vcmask 1041408   ;;  %v593_v5 = vld [vmem:[%s742_s1 + $0x10] sm:$0xf]  ;;  %s747_s19 = smov (!%p206_p3, %s558_s19), 15 }
   0xc   : > { %v275_v1 = vunpack.c.l.b16 %v241_v0  ;;  %v276_v2 = vunpack.c.h.b16 %v241_v0  ;;  %v619_v6 = vld [vmem:[%s742_s1 + $0x14] sm:$0xf0]  ;;  %v618_v7 = vld [vmem:[%s742_s1 + $0x14] sm:$0xf]  ;;  %v595_v8 = vld [vmem:[%s742_s1 + $0x18] sm:$0xf0] }
   0xd   : > { %v594_v11 = vor.u32 %v619_v6, %v593_v5  ;;  %v598_v12 = vor.u32 %v618_v7, %v595_v8  ;;  %v585_v13 = vld [vmem:[%s742_s1] sm:$0xf]  ;;  %v617_v14 = vld [vmem:[%s742_s1 + $0x4] sm:$0xf0]  ;;  %s559_s6 = sshll.u32 %s747_s19, 2  ;;  %vm287_vm1 = vcmask 293888  }
   0xe   : > { %v281_v3 = vpack.c.b16 %v275_v1, %v275_v1  ;;  %v282_v4 = vpack.c.b16 %v276_v2, %v276_v2  ;;  %v616_v15 = vld [vmem:[%s742_s1 + $0x4] sm:$0xf]  ;;  %v587_v16 = vld [vmem:[%s742_s1 + $0x8] sm:$0xf0]  ;;  %v586_v17 = vor.u32 %v617_v14, %v585_v13  ;;  %s209_s13 = scalar_lea.vmem %s741_s0, %s559_s6  ;;  %s609_s14 = sshll.u32 %s747_s19, 3 }
   0xf   : > { %v590_v18 = vor.u32 %v616_v15, %v587_v16  ;;  %v612_v19 = vld [vmem:[%s209_s13] sm:$0xff]  ;;  %v614_v20 = vld [vmem:[%s209_s13 + $0x10] sm:$0xff]  ;;  %v613_v21 = vld [vmem:[%s209_s13 + $0x8] sm:$0xff]  ;;  %s715_s20 = scalar_lea.vmem %s743_s2, %s609_s14  ;;  %s749_s16 = smov (!%p218_p4, %s673_s16), 1 }
  0x10   : > { %v302_v9 = vsel %vm300_vm0, %v281_v3, 0  ;;  %v305_v10 = vsel %vm300_vm0, %v282_v4, 0  ;;  %v615_v22 = vld [vmem:[%s209_s13 + $0x18] sm:$0xff]  ;;  %s610_s19 = sshll.u32 %s749_s16, 4 }
  0x11   : > { %312 = vmatpush.bf16.msra.mxu0 %v302_v9  ;;  %620 = vmatpush.bf16.msra.mxu2 %v302_v9  ;;  %s222_s23 = scalar_lea.vmem %s744_s3, %s610_s19  ;;  %s227_s25 = scalar_lea.vmem %s745_s4, %s610_s19 }
  0x12   : > { %341 = vmatpush.bf16.msra.mxu1 %v305_v10  ;;  %623 = vmatpush.bf16.msra.mxu3 %v305_v10 }
  0x15   : > { %313 = vmatpush.bf16.msra.mxu0 %v594_v11  ;;  %621 = vmatpush.bf16.msra.mxu2 %v594_v11 }
  0x16   : > { %342 = vmatpush.bf16.msra.mxu1 %v598_v12  ;;  %624 = vmatpush.bf16.msra.mxu3 %v598_v12 }
  0x19   : > { %314 = vmatpush.bf16.msra.mxu0 %v586_v17  ;;  %622 = vmatpush.bf16.msra.mxu2 %v586_v17 }
  0x1a   : > { %343 = vmatpush.bf16.msra.mxu1 %v590_v18  ;;  %625 = vmatpush.bf16.msra.mxu3 %v590_v18 }
  0x1c   : > { %599 = vmatmul.msk.bf16.vlgmr.msra.gmra.mxu0 %vm287_vm1, %v612_v19  ;;  %601 = vmatmul.msk.bf16.vlgmr.msra.gmra.mxu2 %vm287_vm1, %v614_v20 }
  0x1d   : > { %603 = vmatmul.msk.bf16.vlgmr.msra.gmra.mxu1 %vm287_vm1, %v612_v19  ;;  %605 = vmatmul.msk.bf16.vlgmr.msra.gmra.mxu3 %vm287_vm1, %v614_v20 }
  0x2c   : > { %600 = vmatmul.msk.bf16.gmra.mxu0 %vm287_vm1, %v613_v21  ;;  %602 = vmatmul.msk.bf16.gmra.mxu2 %vm287_vm1, %v615_v22 }
  0x2d   : > { %604 = vmatmul.msk.bf16.gmra.mxu1 %vm287_vm1, %v613_v21  ;;  %606 = vmatmul.msk.bf16.gmra.mxu3 %vm287_vm1, %v615_v22 }
  0x99   : > { %v316_v23 = vpop.f32.mrf.mxu0 }
  0x9a   : > { %v345_v24 = vpop.f32.mrf.mxu1  ;;  %v397_v40 = vmul.f32 %v316_v23, %v316_v23 }
  0x9b   : > { %v365_v25 = vpack.c.bf16 %v345_v24, %v316_v23  ;;  %v398_v43 = vmul.f32 %v345_v24, %v345_v24 }
  0x9d   : > { %373 = vst [vmem:[%s715_s20] sm:$0xff] %v365_v25 }
  0x9f   : > { %v326_v26 = vpop.f32.mrf.mxu2 }
  0xa0   : > { %v355_v27 = vpop.f32.mrf.mxu3  ;;  %v405_v62 = vmul.f32 %v326_v26, %v326_v26 }
  0xa1   : > { %v369_v28 = vpack.c.bf16 %v355_v27, %v326_v26  ;;  %v318_v29 = vpop.f32.mrf.mxu0  ;;  %v406_v1 = vmul.f32 %v355_v27, %v355_v27 }
  0xa2   : > { %v347_v30 = vpop.f32.mrf.mxu1  ;;  %v399_v38 = vmul.f32 %v318_v29, %v318_v29  ;;  %v381_v41 = vadd.f32 %v318_v29, %v316_v23 }
  0xa3   : > { %377 = vst [vmem:[%s715_s20 + $0x20] sm:$0xff] %v369_v28  ;;  %v366_v31 = vpack.c.bf16 %v347_v30, %v318_v29  ;;  %v400_v39 = vmul.f32 %v347_v30, %v347_v30  ;;  %v388_v44 = vadd.f32 %v347_v30, %v345_v24 }
  0xa4   : > { %v413_v47 = vadd.f32 %v399_v38, %v397_v40 }
  0xa5   : > { %374 = vst [vmem:[%s715_s20 + $0x8] sm:$0xff] %v366_v31  ;;  %v420_v50 = vadd.f32 %v400_v39, %v398_v43 }
  0xa7   : > { %v328_v32 = vpop.f32.mrf.mxu2 }
  0xa8   : > { %v357_v33 = vpop.f32.mrf.mxu3  ;;  %v407_v4 = vmul.f32 %v328_v32, %v328_v32 }
  0xa9   : > { %v370_v34 = vpack.c.bf16 %v357_v33, %v328_v32  ;;  %v321_v35 = vpop.f32.mrf.mxu0  ;;  %v408_v7 = vmul.f32 %v357_v33, %v357_v33 }
  0xaa   : > { %v350_v36 = vpop.f32.mrf.mxu1  ;;  %v401_v42 = vmul.f32 %v321_v35, %v321_v35  ;;  %v382_v48 = vadd.f32 %v381_v41, %v321_v35 }
  0xab   : > { %378 = vst [vmem:[%s715_s20 + $0x28] sm:$0xff] %v370_v34  ;;  %v367_v37 = vpack.c.bf16 %v350_v36, %v321_v35  ;;  %v402_v45 = vmul.f32 %v350_v36, %v350_v36  ;;  %v389_v51 = vadd.f32 %v388_v44, %v350_v36 }
  0xac   : > { %v414_v54 = vadd.f32 %v413_v47, %v401_v42 }
  0xad   : > { %375 = vst [vmem:[%s715_s20 + $0x10] sm:$0xff] %v367_v37  ;;  %v421_v58 = vadd.f32 %v420_v50, %v402_v45 }
  0xaf   : > { %v331_v46 = vpop.f32.mrf.mxu2 }
  0xb0   : > { %v360_v49 = vpop.f32.mrf.mxu3  ;;  %v409_v11 = vmul.f32 %v331_v46, %v331_v46 }
  0xb1   : > { %v371_v52 = vpack.c.bf16 %v360_v49, %v331_v46  ;;  %v323_v53 = vpop.f32.mrf.mxu0  ;;  %v410_v15 = vmul.f32 %v360_v49, %v360_v49 }
  0xb2   : > { %v383_v55 = vadd.f32 %v382_v48, %v323_v53  ;;  %v403_v56 = vmul.f32 %v323_v53, %v323_v53  ;;  %v352_v57 = vpop.f32.mrf.mxu1 }
  0xb3   : > { %379 = vst [vmem:[%s715_s20 + $0x30] sm:$0xff] %v371_v52  ;;  %v368_v59 = vpack.c.bf16 %v352_v57, %v323_v53  ;;  %v390_v60 = vadd.f32 %v389_v51, %v352_v57  ;;  %v404_v61 = vmul.f32 %v352_v57, %v352_v57 }
  0xb4   : > { %v384_v63 = vadd.f32 %v383_v55, %v326_v26  ;;  %v415_v0 = vadd.f32 %v414_v54, %v403_v56 }
  0xb5   : > { %376 = vst [vmem:[%s715_s20 + $0x18] sm:$0xff] %v368_v59  ;;  %v391_v2 = vadd.f32 %v390_v60, %v355_v27  ;;  %v422_v3 = vadd.f32 %v421_v58, %v404_v61 }
  0xb6   : > { %v416_v5 = vadd.f32 %v415_v0, %v405_v62  ;;  %v385_v6 = vadd.f32 %v384_v63, %v328_v32 }
  0xb7   : > { %v423_v8 = vadd.f32 %v422_v3, %v406_v1  ;;  %v333_v9 = vpop.f32.mrf.mxu2  ;;  %v392_v10 = vadd.f32 %v391_v2, %v357_v33 }
  0xb8   : > { %v386_v12 = vadd.f32 %v385_v6, %v331_v46  ;;  %v417_v13 = vadd.f32 %v416_v5, %v407_v4  ;;  %v362_v14 = vpop.f32.mrf.mxu3  ;;  %v411_v20 = vmul.f32 %v333_v9, %v333_v9 }
  0xb9   : > { %v372_v16 = vpack.c.bf16 %v362_v14, %v333_v9  ;;  %v393_v17 = vadd.f32 %v392_v10, %v360_v49  ;;  %v424_v18 = vadd.f32 %v423_v8, %v408_v7  ;;  %v412_v23 = vmul.f32 %v362_v14, %v362_v14 }
  0xba   : > { %v387_v19 = vadd.f32 %v386_v12, %v333_v9  ;;  %v418_v21 = vadd.f32 %v417_v13, %v409_v11 }
  0xbb   : > { %380 = vst [vmem:[%s715_s20 + $0x38] sm:$0xff] %v372_v16  ;;  %v394_v22 = vadd.f32 %v393_v17, %v362_v14  ;;  %v425_v24 = vadd.f32 %v424_v18, %v410_v15 }
  0xbc   : > { %395 = vst [vmem:[%s222_s23] sm:$0xff] %v387_v19  ;;  %v419_v25 = vadd.f32 %v418_v21, %v411_v20 }
  0xbd   : > { %396 = vst [vmem:[%s222_s23 + $0x8] sm:$0xff] %v394_v22  ;;  %v426_v26 = vadd.f32 %v425_v24, %v412_v23 }
  0xbe   : > { %427 = vst [vmem:[%s227_s25] sm:$0xff] %v419_v25 }
  0xbf   : > { %428 = vst [vmem:[%s227_s25 + $0x8] sm:$0xff] %v426_v26 }
  0xc0 PF: > { %s15_s15 = sadd.s32 1, %s640_s15  }
  0xc1   : > { %p12_p5 = scmp.ge.s32.totalorder %s15_s15, 4  }
  0xc3   :  { %14 = sbr.rel (!%p12_p5) target bundleno = 1 (0x1), region = 82 }

// kernel: residual_block_forward.5
= control target key start
LH: loop header
LB: loop body
LE: loop exit
PB: predicated region body
PF: predicated region fallthrough
CT: control target
= control target key end

     0   :  { %s500_s12 = smov 0   ;;  %s502_s13 = smov 0   ;;  %s561_s0 = inlined_call_operand.vmem [shape: bf16[128,256], index: 0, kind: input, shape index: {}]   ;;  %s562_s1 = inlined_call_operand.vmem [shape: f32[1,128], index: 1, kind: input, shape index: {}]   ;;  %s563_s2 = inlined_call_operand.vmem [shape: f32[1,128], index: 2, kind: input, shape index: {}]   ;;  %s564_s3 = inlined_call_operand.vmem [shape: bf16[128,128], index: 3, kind: output, shape index: {}]  }
   0x1   :  { %s504_s14 = smov 0  }
   0x2 LB: > { %s372_s15 = sadd.s32 4294967295, %s478_s14   ;;  %s517_s16 = sadd.s32 1, %s478_s14   ;;  %s478_s14 = sphi %s504_s14, %s567_s14   ;;  %s474_s13 = sphi %s502_s13, %s566_s13   ;;  %s470_s12 = sphi %s500_s12, %s565_s12  }
   0x3   : > { %s17_s17 = ssub.s32 %s478_s14, %s517_s16  ;;  %s20_s18 = sadd.s32 1, %s474_s13 }
   0x4   : > { %p18_p0 = scmp.eq.s32.totalorder %s17_s17, 0  ;;  %p27_p1 = scmp.ne.s32.totalorder %s474_s13, %s470_s12 }
   0x5   : > { %p28_p2 = scmp.eq.s32.totalorder %s478_s14, 0  ;;  %p375_p4 = scmp.ge.s32.totalorder %s478_s14, 2 }
   0x6   : > { %s526_s19 = scalar_select %p18_p0, %s474_s13, %s20_s18  }
   0x7   : > { %p29_p3 = por %p28_p2, %p27_p1  ;;  %127 = sbr.rel (%p375_p4) target bundleno = 24 (0x18), region = 24 }
   0xc   : > { %130 = sbr.rel (!%p29_p3) target bundleno = 24 (0x18), region = 28  ;;  %s132_s20 = sand.u32 (%p29_p3), 1, %s474_s13  }
   0xd   : > { %s387_s21 = sshll.u32 (%p29_p3), %s478_s14, 6  ;;  %s376_s22 = sshll.u32 (%p29_p3), %s132_s20, 5 }
   0xe   : > { %s138_s25 = scalar_lea.vmem (%p29_p3), %s561_s0, %s387_s21  ;;  %s134_s26 = scalar_lea.vmem (%p29_p3), [#allocation2], %s376_s22 }
   0xf   : > { %v155_v0 = vld [vmem:[%s138_s25] sm:$0xf] (%p29_p3)  ;;  %v157_v1 = vld [vmem:[%s138_s25 + $0x8] sm:$0xf] (%p29_p3)  ;;  %v159_v2 = vld [vmem:[%s138_s25 + $0x10] sm:$0xf] (%p29_p3) }
  0x10   : > { %156 = vst [vmem:[%s134_s26] sm:$0xf] (%p29_p3), %v155_v0  ;;  %v161_v3 = vld [vmem:[%s138_s25 + $0x18] sm:$0xf] (%p29_p3)  ;;  %v163_v4 = vld [vmem:[%s138_s25 + $0x20] sm:$0xf] (%p29_p3) }
  0x11   : > { %158 = vst [vmem:[%s134_s26 + $0x4] sm:$0xf] %v157_v1  ;;  %v165_v5 = vld [vmem:[%s138_s25 + $0x28] sm:$0xf]  ;;  %v167_v6 = vld [vmem:[%s138_s25 + $0x30] sm:$0xf] }
  0x12   : > { %160 = vst [vmem:[%s134_s26 + $0x8] sm:$0xf] %v159_v2  ;;  %v169_v7 = vld [vmem:[%s138_s25 + $0x38] sm:$0xf] }
  0x13   : > { %162 = vst [vmem:[%s134_s26 + $0xc] sm:$0xf] %v161_v3 }
  0x14   : > { %164 = vst [vmem:[%s134_s26 + $0x10] sm:$0xf] %v163_v4 }
  0x15   : > { %166 = vst [vmem:[%s134_s26 + $0x14] sm:$0xf] %v165_v5 }
  0x16   : > { %168 = vst [vmem:[%s134_s26 + $0x18] sm:$0xf] %v167_v6 }
  0x17   : > { %170 = vst [vmem:[%s134_s26 + $0x1c] sm:$0xf] %v169_v7 }
  0x18 PF: > { %p380_p5 = scmp.ge.s32.totalorder %s478_s14, 1  ;;  %p209_p6 = scmp.lt.s32.totalorder %s478_s14, 3 }
  0x1a   : > { %p210_p7 = pnand %p380_p5, %p209_p6 }
  0x1b   : > { %s216_s27 = sand.u32 (!%p210_p7), 1, %s470_s12   ;;  %s382_s28 = sshll.u32 (!%p210_p7), %s372_s15, 3 }
  0x1c   : > { %213 = sbr.rel (%p210_p7) target bundleno = 48 (0x30), region = 69  ;;  %s381_s29 = sshll.u32 (!%p210_p7), %s216_s27, 5 }
  0x1d   : > { %p241_p8 = scmp.lt.s32.totalorder (!%p210_p7), %s382_s28, 15  ;;  %s218_s5 = scalar_lea.vmem (!%p210_p7), [#allocation2], %s381_s29 }
  0x21   : > { %v454_v8 = vld [vmem:[%s562_s1] ss:$0 sm:$0xff]  ;;  %v424_v10 = vld [vmem:[%s218_s5 + $0x8] sm:$0xff]   ;;  %v425_v11 = vld [vmem:[%s218_s5 + $0x10] sm:$0xff]   ;;  %s569_s28 = smov (!%p241_p8, %s382_s28), 15 }
  0x22   : > { %v389_v9 = vld [vmem:[%s218_s5] sm:$0xff]   ;;  %v394_v15 = vunpack.c.l.bf16 %v424_v10  ;;  %v395_v16 = vunpack.c.h.bf16 %v424_v10  ;;  %v426_v17 = vld [vmem:[%s218_s5 + $0x18] sm:$0xff]   ;;  %v398_v18 = vunpack.c.l.bf16 %v425_v11  ;;  %v399_v19 = vunpack.c.h.bf16 %v425_v11  ;;  %s383_s8 = sshll.u32 %s569_s28, 2 }
  0x23   : > { %v390_v12 = vunpack.c.l.bf16 %v389_v9  ;;  %v391_v13 = vunpack.c.h.bf16 %v389_v9  ;;  %v455_v14 = vld [vmem:[%s563_s2] ss:$0 sm:$0xff]  ;;  %v402_v20 = vunpack.c.l.bf16 %v426_v17  ;;  %v403_v21 = vunpack.c.h.bf16 %v426_v17  ;;  %s244_s11 = scalar_lea.vmem %s564_s3, %s383_s8 }
  0x24   : > { %v268_v24 = vmul.f32 %v454_v8, %v394_v15  ;;  %v269_v25 = vmul.f32 %v454_v8, %v395_v16  ;;  %v270_v26 = vmul.f32 %v454_v8, %v398_v18  ;;  %v271_v27 = vmul.f32 %v454_v8, %v399_v19 }
  0x25   : > { %v266_v22 = vmul.f32 %v454_v8, %v390_v12  ;;  %v267_v23 = vmul.f32 %v454_v8, %v391_v13  ;;  %v272_v28 = vmul.f32 %v454_v8, %v402_v20  ;;  %v273_v29 = vmul.f32 %v454_v8, %v403_v21 }
  0x26   : > { %v280_v32 = vadd.f32 %v455_v14, %v268_v24  ;;  %v281_v33 = vadd.f32 %v455_v14, %v269_v25  ;;  %v282_v34 = vadd.f32 %v455_v14, %v270_v26  ;;  %v283_v35 = vadd.f32 %v455_v14, %v271_v27 }
  0x27   : > { %v278_v30 = vadd.f32 %v455_v14, %v266_v22  ;;  %v279_v31 = vadd.f32 %v455_v14, %v267_v23  ;;  %v284_v36 = vadd.f32 %v455_v14, %v272_v28  ;;  %v285_v37 = vadd.f32 %v455_v14, %v273_v29 }
  0x28   : > { %v288_v40 = vmax.f32 %v280_v32, 0.0  ;;  %v289_v41 = vmax.f32 %v281_v33, 0.0  ;;  %v290_v42 = vmax.f32 %v282_v34, 0.0  ;;  %v291_v43 = vmax.f32 %v283_v35, 0.0 }
  0x29   : > { %v286_v38 = vmax.f32 %v278_v30, 0.0  ;;  %v287_v39 = vmax.f32 %v279_v31, 0.0  ;;  %v292_v44 = vmax.f32 %v284_v36, 0.0  ;;  %v293_v45 = vmax.f32 %v285_v37, 0.0 }
  0x2a   : > { %v412_v47 = vpack.c.bf16 %v289_v41, %v288_v40  ;;  %v417_v48 = vpack.c.bf16 %v291_v43, %v290_v42 }
  0x2b   : > { %v407_v46 = vpack.c.bf16 %v287_v39, %v286_v38  ;;  %v422_v49 = vpack.c.bf16 %v293_v45, %v292_v44 }
  0x2c   : > { %427 = vst [vmem:[%s244_s11 + $0x8] sm:$0xff] %v412_v47  }
  0x2d   : > { %408 = vst [vmem:[%s244_s11] sm:$0xff] %v407_v46  }
  0x2e   : > { %428 = vst [vmem:[%s244_s11 + $0x10] sm:$0xff] %v417_v48  }
  0x2f   : > { %429 = vst [vmem:[%s244_s11 + $0x18] sm:$0xff] %v422_v49  }
  0x30 PF: > { %p10_p9 = scmp.ge.s32.totalorder %s517_s16, 4   ;;  %s565_s12 = smov %s474_s13 }
  0x31   : > { %s566_s13 = smov %s526_s19  ;;  %s567_s14 = smov %s517_s16 }
  0x32   :  { %12 = sbr.rel (!%p10_p9) target bundleno = 2 (0x2), region = 108 }

// kernel: residual_block_forward.6
= control target key start
LH: loop header
LB: loop body
LE: loop exit
PB: predicated region body
PF: predicated region fallthrough
CT: control target
= control target key end

     0   :  { %s627_s15 = smov 0   ;;  %s679_s0 = inlined_call_operand.vmem [shape: bf16[128,72], index: 0, kind: input, shape index: {}]   ;;  %s680_s1 = inlined_call_operand.vmem [shape: bf16[72,128], index: 1, kind: input, shape index: {}]   ;;  %s681_s2 = inlined_call_operand.vmem [shape: bf16[128,128], index: 2, kind: output, shape index: {0}]   ;;  %s682_s3 = inlined_call_operand.vmem [shape: f32[2,8,128], index: 3, kind: output, shape index: {1}]   ;;  %s683_s4 = inlined_call_operand.vmem [shape: f32[2,8,128], index: 4, kind: output, shape index: {2}]  }
   0x1 LB: > { %s633_s16 = sadd.s32 4294967295, %s600_s15   ;;  %p495_p0 = scmp.ge.s32.totalorder %s600_s15, 1  ;;  %s600_s15 = sphi %s627_s15, %s15_s15  }
   0x2   : > { %p168_p1 = scmp.lt.s32.totalorder %s600_s15, 3 }
   0x4   : > { %p169_p2 = pnand %p495_p0, %p168_p1 }
   0x5   : > { %s496_s19 = sshll.u32 (!%p169_p2), %s633_s16, 3  ;;  %p214_p4 = scmp.lt.s32.totalorder (!%p169_p2), %s633_s16, 1 }
   0x6   : > { %172 = sbr.rel (%p169_p2) target bundleno = 187 (0xbb), region = 28  ;;  %p203_p3 = scmp.lt.s32.totalorder (!%p169_p2), %s496_s19, 15 }
   0xb   : > { %v239_v0 = vld [vmem:[%s680_s1 + $0x20] sm:$0xf]  ;;  %vm300_vm0 = vcmask 1043456   ;;  %v547_v4 = vld [vmem:[%s680_s1 + $0x18] sm:$0xff]  ;;  %v546_v5 = vld [vmem:[%s680_s1 + $0x10] sm:$0xff]  ;;  %s685_s19 = smov (!%p203_p3, %s496_s19), 15 }
   0xc   : > { %v277_v1 = vunpack.c.l.b16 %v239_v0  ;;  %v545_v6 = vld [vmem:[%s680_s1 + $0x8] sm:$0xff]  ;;  %s497_s26 = sshll.u32 %s685_s19, 2  ;;  %v544_v7 = vld [vmem:[%s680_s1] sm:$0xff]  ;;  %vm287_vm1 = vcmask 588800   ;;  %s687_s16 = smov (!%p214_p4, %s633_s16), 1 }
   0xd   : > { %s206_s5 = scalar_lea.vmem %s679_s0, %s497_s26  ;;  %s662_s8 = scalar_lea.vmem %s681_s2, %s497_s26 }
   0xe   : > { %v282_v2 = vpack.c.b16 %v277_v1, %v277_v1  ;;  %v540_v8 = vld [vmem:[%s206_s5] sm:$0xff]  ;;  %v541_v9 = vld [vmem:[%s206_s5 + $0x8] sm:$0xff]  ;;  %v542_v10 = vld [vmem:[%s206_s5 + $0x10] sm:$0xff]  ;;  %s500_s9 = sshll.u32 %s687_s16, 3 }
   0xf   : > { %v543_v11 = vld [vmem:[%s206_s5 + $0x18] sm:$0xff]  ;;  %s217_s12 = scalar_lea.vmem %s682_s3, %s500_s9  ;;  %s221_s17 = scalar_lea.vmem %s683_s4, %s500_s9 }
  0x10   : > { %v302_v3 = vsel %vm300_vm0, %v282_v2, 0 }
  0x11   : > { %307 = vmatpush.bf16.msra.mxu0 %v302_v3  ;;  %571 = vmatpush.bf16.msra.mxu1 %v302_v3 }
  0x12   : > { %572 = vmatpush.bf16.msra.mxu2 %v302_v3  ;;  %573 = vmatpush.bf16.msra.mxu3 %v302_v3 }
  0x15   : > { %308 = vmatpush.bf16.msra.mxu0 %v547_v4  ;;  %574 = vmatpush.bf16.msra.mxu1 %v547_v4 }
  0x16   : > { %575 = vmatpush.bf16.msra.mxu2 %v547_v4  ;;  %576 = vmatpush.bf16.msra.mxu3 %v547_v4 }
  0x19   : > { %309 = vmatpush.bf16.msra.mxu0 %v546_v5  ;;  %577 = vmatpush.bf16.msra.mxu1 %v546_v5 }
  0x1a   : > { %578 = vmatpush.bf16.msra.mxu2 %v546_v5  ;;  %579 = vmatpush.bf16.msra.mxu3 %v546_v5 }
  0x1d   : > { %310 = vmatpush.bf16.msra.mxu0 %v545_v6  ;;  %580 = vmatpush.bf16.msra.mxu1 %v545_v6 }
  0x1e   : > { %581 = vmatpush.bf16.msra.mxu2 %v545_v6  ;;  %582 = vmatpush.bf16.msra.mxu3 %v545_v6 }
  0x21   : > { %311 = vmatpush.bf16.msra.mxu0 %v544_v7  ;;  %583 = vmatpush.bf16.msra.mxu1 %v544_v7 }
  0x22   : > { %584 = vmatpush.bf16.msra.mxu2 %v544_v7  ;;  %585 = vmatpush.bf16.msra.mxu3 %v544_v7 }
  0x24   : > { %534 = vmatmul.msk.bf16.vlgmr.msra.gmra.mxu0 %vm287_vm1, %v540_v8  ;;  %535 = vmatmul.msk.bf16.vlgmr.msra.gmra.mxu1 %vm287_vm1, %v541_v9 }
  0x25   : > { %536 = vmatmul.msk.bf16.vlgmr.msra.gmra.mxu2 %vm287_vm1, %v542_v10  ;;  %537 = vmatmul.msk.bf16.vlgmr.msra.gmra.mxu3 %vm287_vm1, %v543_v11 }
  0xa1   : > { %v313_v12 = vpop.f32.mrf.mxu0  ;;  %v318_v13 = vpop.f32.mrf.mxu1 }
  0xa2   : > { %v357_v16 = vmul.f32 %v313_v12, %v313_v12  ;;  %v359_v23 = vmul.f32 %v318_v13, %v318_v13 }
  0xa8   : > { %v323_v14 = vpop.f32.mrf.mxu2  ;;  %v328_v15 = vpop.f32.mrf.mxu3 }
  0xa9   : > { %v315_v17 = vpop.f32.mrf.mxu0  ;;  %v320_v18 = vpop.f32.mrf.mxu1  ;;  %v361_v29 = vmul.f32 %v323_v14, %v323_v14  ;;  %v363_v39 = vmul.f32 %v328_v15, %v328_v15 }
  0xaa   : > { %v551_v19 = vpack.c.bf16 %v315_v17, %v313_v12  ;;  %v349_v20 = vadd.f32 %v315_v17, %v313_v12  ;;  %v358_v21 = vmul.f32 %v315_v17, %v315_v17  ;;  %v556_v22 = vpack.c.bf16 %v320_v18, %v318_v13 }
  0xab   : > { %v360_v27 = vmul.f32 %v320_v18, %v320_v18 }
  0xac   : > { %552 = vst [vmem:[%s662_s8] sm:$0xff] %v551_v19   ;;  %v365_v24 = vadd.f32 %v358_v21, %v357_v16  ;;  %v350_v25 = vadd.f32 %v349_v20, %v318_v13 }
  0xad   : > { %568 = vst [vmem:[%s662_s8 + $0x8] sm:$0xff] %v556_v22  }
  0xae   : > { %v351_v26 = vadd.f32 %v350_v25, %v320_v18  ;;  %v366_v28 = vadd.f32 %v365_v24, %v359_v23 }
  0xb0   : > { %v367_v30 = vadd.f32 %v366_v28, %v360_v27  ;;  %v325_v31 = vpop.f32.mrf.mxu2  ;;  %v352_v32 = vadd.f32 %v351_v26, %v323_v14  ;;  %v330_v33 = vpop.f32.mrf.mxu3 }
  0xb1   : > { %v561_v34 = vpack.c.bf16 %v325_v31, %v323_v14  ;;  %v566_v35 = vpack.c.bf16 %v330_v33, %v328_v15  ;;  %v362_v37 = vmul.f32 %v325_v31, %v325_v31  ;;  %v364_v43 = vmul.f32 %v330_v33, %v330_v33 }
  0xb2   : > { %v353_v36 = vadd.f32 %v352_v32, %v325_v31  ;;  %v368_v38 = vadd.f32 %v367_v30, %v361_v29 }
  0xb3   : > { %569 = vst [vmem:[%s662_s8 + $0x10] sm:$0xff] %v561_v34  }
  0xb4   : > { %v369_v40 = vadd.f32 %v368_v38, %v362_v37  ;;  %570 = vst [vmem:[%s662_s8 + $0x18] sm:$0xff] %v566_v35   ;;  %v354_v41 = vadd.f32 %v353_v36, %v328_v15 }
  0xb6   : > { %v355_v42 = vadd.f32 %v354_v41, %v330_v33  ;;  %v370_v44 = vadd.f32 %v369_v40, %v363_v39 }
  0xb8   : > { %356 = vst [vmem:[%s217_s12] sm:$0xff] %v355_v42  ;;  %v371_v45 = vadd.f32 %v370_v44, %v364_v43 }
  0xba   : > { %372 = vst [vmem:[%s221_s17] sm:$0xff] %v371_v45 }
  0xbb PF: > { %s15_s15 = sadd.s32 1, %s600_s15  }
  0xbc   : > { %p12_p5 = scmp.ge.s32.totalorder %s15_s15, 4  }
  0xbe   :  { %14 = sbr.rel (!%p12_p5) target bundleno = 1 (0x1), region = 82 }

// kernel: residual_block_forward.7
= control target key start
LH: loop header
LB: loop body
LE: loop exit
PB: predicated region body
PF: predicated region fallthrough
CT: control target
= control target key end

     0   :  { %s679_s21 = smov 0   ;;  %s681_s22 = smov 0   ;;  %s774_s0 = inlined_call_operand.vmem [shape: bf16[128,128], index: 0, kind: input, shape index: {}]   ;;  %s775_s1 = inlined_call_operand.vmem [shape: f32[1,128], index: 1, kind: input, shape index: {}]   ;;  %s776_s2 = inlined_call_operand.vmem [shape: f32[1,128], index: 2, kind: input, shape index: {}]   ;;  %s777_s3 = inlined_call_operand.vmem [shape: bf16[128,256], index: 3, kind: input, shape index: {}]   ;;  %s778_s4 = inlined_call_operand.vmem [shape: f32[1,128], index: 4, kind: input, shape index: {}]   ;;  %s779_s5 = inlined_call_operand.vmem [shape: f32[1,128], index: 5, kind: input, shape index: {}]   ;;  %s780_s6 = inlined_call_operand.vmem [shape: f32[128,128], index: 6, kind: output, shape index: {}]  }
   0x1   :  { %s683_s23 = smov 0  }
   0x2 LB: > { %s530_s24 = sadd.s32 4294967295, %s642_s23   ;;  %s696_s25 = sadd.s32 1, %s642_s23   ;;  %s642_s23 = sphi %s683_s23, %s783_s23   ;;  %s638_s22 = sphi %s681_s22, %s782_s22   ;;  %s634_s21 = sphi %s679_s21, %s781_s21  }
   0x3   : > { %s88_s26 = ssub.s32 %s642_s23, %s696_s25  ;;  %s91_s27 = sadd.s32 1, %s638_s22 }
   0x4   : > { %p89_p0 = scmp.eq.s32.totalorder %s88_s26, 0  ;;  %p98_p1 = scmp.ne.s32.totalorder %s638_s22, %s634_s21 }
   0x5   : > { %p99_p2 = scmp.eq.s32.totalorder %s642_s23, 0  ;;  %p533_p4 = scmp.ge.s32.totalorder %s642_s23, 2 }
   0x6   : > { %s705_s28 = scalar_select %p89_p0, %s638_s22, %s91_s27  }
   0x7   : > { %p100_p3 = por %p99_p2, %p98_p1  ;;  %204 = sbr.rel (%p533_p4) target bundleno = 24 (0x18), region = 32 }
   0xc   : > { %216 = sbr.rel (!%p100_p3) target bundleno = 24 (0x18), region = 40  ;;  %s218_s29 = sand.u32 (%p100_p3), 1, %s638_s22  }
   0xd   : > { %s553_s30 = sshll.u32 (%p100_p3), %s642_s23, 6  ;;  %s534_s7 = sshll.u32 (%p100_p3), %s218_s29, 5 }
   0xe   : > { %s482_s10 = scalar_lea.vmem (%p100_p3), %s777_s3, %s553_s30  ;;  %s220_s11 = scalar_lea.vmem (%p100_p3), [#allocation2], %s534_s7 }
   0xf   : > { %v537_v0 = vld [vmem:[%s482_s10 + $0x4] sm:$0xf] (%p100_p3)  ;;  %v538_v1 = vld [vmem:[%s482_s10 + $0xc] sm:$0xf] (%p100_p3)  ;;  %v539_v2 = vld [vmem:[%s482_s10 + $0x14] sm:$0xf] (%p100_p3) }
  0x10   : > { %243 = vst [vmem:[%s220_s11] sm:$0xf] (%p100_p3), %v537_v0  ;;  %v540_v3 = vld [vmem:[%s482_s10 + $0x1c] sm:$0xf] (%p100_p3)  ;;  %v541_v4 = vld [vmem:[%s482_s10 + $0x24] sm:$0xf] (%p100_p3) }
  0x11   : > { %245 = vst [vmem:[%s220_s11 + $0x4] sm:$0xf] %v538_v1  ;;  %v542_v5 = vld [vmem:[%s482_s10 + $0x2c] sm:$0xf]  ;;  %v543_v6 = vld [vmem:[%s482_s10 + $0x34] sm:$0xf] }
  0x12   : > { %247 = vst [vmem:[%s220_s11 + $0x8] sm:$0xf] %v539_v2  ;;  %v544_v7 = vld [vmem:[%s482_s10 + $0x3c] sm:$0xf] }
  0x13   : > { %249 = vst [vmem:[%s220_s11 + $0xc] sm:$0xf] %v540_v3 }
  0x14   : > { %251 = vst [vmem:[%s220_s11 + $0x10] sm:$0xf] %v541_v4 }
  0x15   : > { %253 = vst [vmem:[%s220_s11 + $0x14] sm:$0xf] %v542_v5 }
  0x16   : > { %255 = vst [vmem:[%s220_s11 + $0x18] sm:$0xf] %v543_v6 }
  0x17   : > { %257 = vst [vmem:[%s220_s11 + $0x1c] sm:$0xf] %v544_v7 }
  0x18 PF: > { %p545_p5 = scmp.ge.s32.totalorder %s642_s23, 1  ;;  %p296_p6 = scmp.lt.s32.totalorder %s642_s23, 3 }
  0x1a   : > { %p297_p7 = pnand %p545_p5, %p296_p6 }
  0x1b   : > { %s303_s12 = sand.u32 (!%p297_p7), 1, %s634_s21   ;;  %s547_s13 = sshll.u32 (!%p297_p7), %s530_s24, 3 }
  0x1c   : > { %300 = sbr.rel (%p297_p7) target bundleno = 58 (0x3a), region = 81  ;;  %s546_s14 = sshll.u32 (!%p297_p7), %s303_s12, 5 }
  0x1d   : > { %p338_p8 = scmp.lt.s32.totalorder (!%p297_p7), %s547_s13, 15  ;;  %s305_s17 = scalar_lea.vmem (!%p297_p7), [#allocation2], %s546_s14 }
  0x21   : > { %v721_v8 = vld [vmem:[%s778_s4] ss:$0 sm:$0xff]  ;;  %s785_s13 = smov (!%p338_p8, %s547_s13), 15  ;;  %v589_v13 = vld [vmem:[%s305_s17 + $0x8] sm:$0xff]   ;;  %v590_v14 = vld [vmem:[%s305_s17 + $0x10] sm:$0xff]  }
  0x22   : > { %v571_v9 = vld [vmem:[%s305_s17] sm:$0xff]   ;;  %v730_v15 = vld [vmem:[%s305_s17 + $0x18] sm:$0xff]   ;;  %s548_s20 = sshll.u32 %s785_s13, 2  ;;  %v576_v16 = vunpack.c.l.bf16 %v589_v13  ;;  %v577_v17 = vunpack.c.h.bf16 %v589_v13  ;;  %v580_v18 = vunpack.c.l.bf16 %v590_v14  ;;  %v581_v19 = vunpack.c.h.bf16 %v590_v14  ;;  %s550_s7 = sshll.u32 %s785_s13, 3 }
  0x23   : > { %v728_v10 = vld [vmem:[%s779_s5] ss:$0 sm:$0xff]  ;;  %v572_v11 = vunpack.c.l.bf16 %v571_v9  ;;  %v573_v12 = vunpack.c.h.bf16 %v571_v9  ;;  %s341_s24 = scalar_lea.vmem %s774_s0, %s548_s20  ;;  %v584_v23 = vunpack.c.l.bf16 %v730_v15  ;;  %v585_v24 = vunpack.c.h.bf16 %v730_v15  ;;  %s348_s10 = scalar_lea.vmem %s780_s6, %s550_s7 }
  0x24   : > { %v616_v20 = vld [vmem:[%s775_s1] ss:$0 sm:$0xff]  ;;  %v586_v26 = vld [vmem:[%s341_s24 + $0x8] sm:$0xff]   ;;  %v412_v27 = vmul.f32 %v721_v8, %v576_v16  ;;  %v413_v28 = vmul.f32 %v721_v8, %v577_v17  ;;  %v587_v29 = vld [vmem:[%s341_s24 + $0x10] sm:$0xff]   ;;  %v414_v30 = vmul.f32 %v721_v8, %v580_v18  ;;  %v415_v31 = vmul.f32 %v721_v8, %v581_v19 }
  0x25   : > { %v410_v21 = vmul.f32 %v721_v8, %v572_v11  ;;  %v411_v22 = vmul.f32 %v721_v8, %v573_v12  ;;  %v555_v25 = vld [vmem:[%s341_s24] sm:$0xff]   ;;  %v560_v37 = vunpack.c.l.bf16 %v586_v26  ;;  %v561_v39 = vunpack.c.h.bf16 %v586_v26  ;;  %v588_v41 = vld [vmem:[%s341_s24 + $0x18] sm:$0xff]  }
  0x26   : > { %v556_v32 = vunpack.c.l.bf16 %v555_v25  ;;  %v617_v33 = vld [vmem:[%s776_s2] ss:$0 sm:$0xff]  ;;  %v557_v35 = vunpack.c.h.bf16 %v555_v25  ;;  %v424_v38 = vadd.f32 %v728_v10, %v412_v27  ;;  %v425_v40 = vadd.f32 %v728_v10, %v413_v28 }
  0x27   : > { %v422_v34 = vadd.f32 %v728_v10, %v410_v21  ;;  %v423_v36 = vadd.f32 %v728_v10, %v411_v22  ;;  %v564_v44 = vunpack.c.l.bf16 %v587_v29  ;;  %v426_v45 = vadd.f32 %v728_v10, %v414_v30 }
  0x28   : > { %v370_v42 = vmul.f32 %v616_v20, %v556_v32  ;;  %v371_v43 = vmul.f32 %v616_v20, %v557_v35  ;;  %v372_v46 = vmul.f32 %v616_v20, %v560_v37  ;;  %v373_v47 = vmul.f32 %v616_v20, %v561_v39 }
  0x29   : > { %v565_v48 = vunpack.c.h.bf16 %v587_v29  ;;  %v427_v49 = vadd.f32 %v728_v10, %v415_v31  ;;  %v374_v52 = vmul.f32 %v616_v20, %v564_v44  ;;  %v568_v53 = vunpack.c.l.bf16 %v588_v41 }
  0x2a   : > { %v382_v50 = vadd.f32 %v617_v33, %v370_v42  ;;  %v383_v51 = vadd.f32 %v617_v33, %v371_v43  ;;  %v384_v54 = vadd.f32 %v617_v33, %v372_v46  ;;  %v385_v55 = vadd.f32 %v617_v33, %v373_v47 }
  0x2b   : > { %v375_v56 = vmul.f32 %v616_v20, %v565_v48  ;;  %v416_v57 = vmul.f32 %v721_v8, %v584_v23  ;;  %v386_v60 = vadd.f32 %v617_v33, %v374_v52  ;;  %v376_v61 = vmul.f32 %v616_v20, %v568_v53 }
  0x2c   : > { %v430_v58 = vadd.f32 %v422_v34, %v382_v50  ;;  %v431_v59 = vadd.f32 %v423_v36, %v383_v51  ;;  %v432_v62 = vadd.f32 %v424_v38, %v384_v54  ;;  %v433_v63 = vadd.f32 %v425_v40, %v385_v55 }
  0x2d   : > { %v387_v0 = vadd.f32 %v617_v33, %v375_v56  ;;  %v428_v1 = vadd.f32 %v728_v10, %v416_v57  ;;  %v434_v4 = vadd.f32 %v426_v45, %v386_v60  ;;  %v388_v5 = vadd.f32 %v617_v33, %v376_v61 }
  0x2e   : > { %v438_v2 = vmax.f32 %v430_v58, 0.0  ;;  %v439_v3 = vmax.f32 %v431_v59, 0.0  ;;  %v440_v6 = vmax.f32 %v432_v62, 0.0  ;;  %v441_v7 = vmax.f32 %v433_v63, 0.0 }
  0x2f   : > { %v435_v9 = vadd.f32 %v427_v49, %v387_v0  ;;  %v569_v11 = vunpack.c.h.bf16 %v588_v41  ;;  %v442_v12 = vmax.f32 %v434_v4, 0.0  ;;  %v436_v13 = vadd.f32 %v428_v1, %v388_v5 }
  0x30   : > { %446 = vst [vmem:[%s348_s10] sm:$0xff] %v438_v2  ;;  %v417_v14 = vmul.f32 %v721_v8, %v585_v24 }
  0x31   : > { %447 = vst [vmem:[%s348_s10 + $0x8] sm:$0xff] %v439_v3  ;;  %v443_v15 = vmax.f32 %v435_v9, 0.0  ;;  %v377_v16 = vmul.f32 %v616_v20, %v569_v11  ;;  %v444_v17 = vmax.f32 %v436_v13, 0.0 }
  0x32   : > { %448 = vst [vmem:[%s348_s10 + $0x10] sm:$0xff] %v440_v6  ;;  %v429_v18 = vadd.f32 %v728_v10, %v417_v14 }
  0x33   : > { %449 = vst [vmem:[%s348_s10 + $0x18] sm:$0xff] %v441_v7  ;;  %v389_v19 = vadd.f32 %v617_v33, %v377_v16 }
  0x34   : > { %450 = vst [vmem:[%s348_s10 + $0x20] sm:$0xff] %v442_v12 }
  0x35   : > { %451 = vst [vmem:[%s348_s10 + $0x28] sm:$0xff] %v443_v15  ;;  %v437_v21 = vadd.f32 %v429_v18, %v389_v19 }
  0x36   : > { %452 = vst [vmem:[%s348_s10 + $0x30] sm:$0xff] %v444_v17 }
  0x37   : > { %v445_v22 = vmax.f32 %v437_v21, 0.0 }
  0x39   : > { %453 = vst [vmem:[%s348_s10 + $0x38] sm:$0xff] %v445_v22 }
  0x3a PF: > { %p13_p9 = scmp.ge.s32.totalorder %s696_s25, 4   ;;  %s781_s21 = smov %s638_s22 }
  0x3b   : > { %s782_s22 = smov %s705_s28  ;;  %s783_s23 = smov %s696_s25 }
  0x3c   :  { %15 = sbr.rel (!%p13_p9) target bundleno = 2 (0x2), region = 123 }

</bundles_post_ra>
